<compile_context>
chip_gen: v7x
topology: tpu7x:2x2x1
jax: 0.10.0
libtpu: 0.0.40
codegen_flags: <defaults>
</compile_context>

<pallas_src>
import functools

import jax
import jax.numpy as jnp
from jax.experimental import pallas as pl
from jax.experimental.pallas import tpu as pltpu

K = 4          # number of assets
F = 3          # features per asset (price change, portfolio ratio, cushion)
HIDDEN = 128
D_IN = F * K


def _round_up(x, m):
    return ((x + m - 1) // m) * m


def _cdiv(a, b):
    return (a + b - 1) // b


def _score_net_kernel(x_ref, w1_ref, b1_ref, w2_ref, b2_ref, w3t_ref, b3_ref,
                      o_ref):
    # In-kernel f32 -> bf16 cast of the activation tile (free on the VPU).
    x = x_ref[...].astype(jnp.bfloat16)
    # Layer 1: [TB, D_IN](bf16) @ [D_IN, H](bf16) -> f32 acc, bias+relu in f32.
    h1 = jnp.dot(x, w1_ref[...], preferred_element_type=jnp.float32)
    h1 = jnp.maximum(h1 + b1_ref[...], 0.0).astype(jnp.bfloat16)
    # Layer 2: [TB, H] @ [H, H]
    h2 = jnp.dot(h1, w2_ref[...], preferred_element_type=jnp.float32)
    h2 = jnp.maximum(h2 + b2_ref[...], 0.0).astype(jnp.bfloat16)
    # Layer 3, transposed output: w3t [K, H] contracted with h2 [TB, H] on H
    # -> [K, TB]  (lane-dense along the batch axis).
    out = jax.lax.dot_general(
        w3t_ref[...], h2,
        dimension_numbers=(((1,), (1,)), ((), ())),
        preferred_element_type=jnp.float32)
    o_ref[...] = (out + b3_ref[...]).astype(o_ref.dtype)


def prepare_params(params):
    """Cast weights to bf16; store layer-3 weight/bias transposed (K-major)."""
    return dict(
        w1=params["w1"].astype(jnp.bfloat16),                 # (D_IN, H)
        b1=params["b1"].astype(jnp.float32),                  # (1, H)
        w2=params["w2"].astype(jnp.bfloat16),                 # (H, H)
        b2=params["b2"].astype(jnp.float32),                  # (1, H)
        w3t=params["w3"].T.astype(jnp.bfloat16),              # (K, H)
        b3t=params["b3"].reshape(K, 1).astype(jnp.float32),   # (K, 1)
    )


@functools.partial(jax.jit, static_argnames=("tb",))
def score_net_forward(x, prepped, *, tb=1024):
    """x: [B, F*K] float32.  prepped: output of prepare_params().  -> [B, K]."""
    B = x.shape[0]
    x = x.astype(jnp.float32)

    # Batch tile: multiple of 128 so the (K, TB) output block is lane-dense
    # and the (TB, D_IN) input block satisfies the (8,128) sublane rule.
    tb = max(128, _round_up(tb, 128))
    TB = min(tb, _round_up(B, 128))
    if B >= 256:
        # Keep >= 2 grid steps so the "parallel" batch axis can shard across
        # both TensorCores on v7x (and stay pipelined elsewhere).
        TB = min(TB, _round_up(_cdiv(B, 2), 128))
    B_pad = _round_up(B, TB)
    if B_pad != B:
        x = jnp.pad(x, ((0, B_pad - B), (0, 0)))

    grid = (B_pad // TB,)
    grid_spec = pltpu.PrefetchScalarGridSpec(
        num_scalar_prefetch=0,
        grid=grid,
        in_specs=[
            # Batch-tiled activation input (f32; cast happens in-kernel).
            pl.BlockSpec((TB, D_IN), lambda i: (i, 0)),
            # Weights / biases: constant index_map -> VMEM-resident, fetched
            # only once across the whole grid.
            pl.BlockSpec((D_IN, HIDDEN), lambda i: (0, 0)),
            pl.BlockSpec((1, HIDDEN), lambda i: (0, 0)),
            pl.BlockSpec((HIDDEN, HIDDEN), lambda i: (0, 0)),
            pl.BlockSpec((1, HIDDEN), lambda i: (0, 0)),
            pl.BlockSpec((K, HIDDEN), lambda i: (0, 0)),
            pl.BlockSpec((K, 1), lambda i: (0, 0)),
        ],
        # Transposed, lane-dense output: (K, B_pad) tiled along the batch.
        out_specs=pl.BlockSpec((K, TB), lambda i: (0, i)),
    )

    out_t = pl.pallas_call(
        _score_net_kernel,
        out_shape=jax.ShapeDtypeStruct((K, B_pad), jnp.float32),
        grid_spec=grid_spec,
        compiler_params=pltpu.CompilerParams(
            dimension_semantics=("parallel",),
            vmem_limit_bytes=32 * 1024 * 1024,
        ),
    )(x, prepped["w1"], prepped["b1"], prepped["w2"], prepped["b2"],
      prepped["w3t"], prepped["b3t"])

    # Drop batch padding and restore [B, K] layout (cheap: only K*B floats).
    return out_t[:, :B].T


def init_params(key):
    """Deterministic PyTorch-style uniform(-1/sqrt(fan_in), 1/sqrt(fan_in))."""
    ks = jax.random.split(key, 6)

    def lin(kw, kb, fan_in, fan_out):
        bound = 1.0 / jnp.sqrt(jnp.float32(fan_in))
        w = jax.random.uniform(kw, (fan_in, fan_out), jnp.float32,
                               minval=-bound, maxval=bound)
        b = jax.random.uniform(kb, (1, fan_out), jnp.float32,
                               minval=-bound, maxval=bound)
        return w, b

    w1, b1 = lin(ks[0], ks[1], D_IN, HIDDEN)
    w2, b2 = lin(ks[2], ks[3], HIDDEN, HIDDEN)
    w3, b3 = lin(ks[4], ks[5], HIDDEN, K)
    return dict(w1=w1, b1=b1, w2=w2, b2=b2, w3=w3, b3=b3)


def reference_forward_f32(x, p):
    h1 = jnp.maximum(x @ p["w1"] + p["b1"], 0.0)
    h2 = jnp.maximum(h1 @ p["w2"] + p["b2"], 0.0)
    return h2 @ p["w3"] + p["b3"]


def reference_forward_bf16(x, p):
    """Mirrors the kernel math: bf16 operands, f32 accumulation."""
    xb = x.astype(jnp.bfloat16)
    w1 = p["w1"].astype(jnp.bfloat16)
    w2 = p["w2"].astype(jnp.bfloat16)
    w3 = p["w3"].astype(jnp.bfloat16)
    h1 = jnp.maximum(
        jnp.dot(xb, w1, preferred_element_type=jnp.float32) + p["b1"], 0.0)
    h2 = jnp.maximum(
        jnp.dot(h1.astype(jnp.bfloat16), w2,
                preferred_element_type=jnp.float32) + p["b2"], 0.0)
    return jnp.dot(h2.astype(jnp.bfloat16), w3,
                   preferred_element_type=jnp.float32) + p["b3"]


if __name__ == "__main__":
    key = jax.random.PRNGKey(0)
    kp, kx, kx2 = jax.random.split(key, 3)
    params = init_params(kp)
    prepped = prepare_params(params)

    # ---- small-shape test (matches the module's [B, K, F] state layout) ----
    B = 2
    state = jax.random.normal(kx, (B, K, F), jnp.float32)
    x = state.reshape(B, D_IN)

    out = score_net_forward(x, prepped)
    out = jax.block_until_ready(out)
    assert out.shape == (B, K)

    ref_bf16 = reference_forward_bf16(x, params)
    ref_f32 = reference_forward_f32(x, params)
    assert jnp.allclose(out, ref_bf16, atol=1e-4, rtol=1e-4), "bf16 ref mismatch"
    assert jnp.allclose(out, ref_f32, atol=5e-2, rtol=5e-2), "f32 ref mismatch"

    # ---- multi-tile test: exercises the batch grid + padding path ----------
    B2 = 300
    x2 = jax.random.normal(kx2, (B2, D_IN), jnp.float32)
    out2 = jax.block_until_ready(score_net_forward(x2, prepped, tb=128))
    assert out2.shape == (B2, K)
    ref2 = reference_forward_bf16(x2, params)
    assert jnp.allclose(out2, ref2, atol=1e-4, rtol=1e-4), "tiled run mismatch"

    # ---- default-tile test (>=2 grid steps path for B >= 256) --------------
    out3 = jax.block_until_ready(score_net_forward(x2, prepped))
    assert out3.shape == (B2, K)
    assert jnp.allclose(out3, ref2, atol=1e-4, rtol=1e-4), "default-tile mismatch"

    # TODO(synk): entropy/log_prob/sampling use torch.distributions.Dirichlet
    # (gamma sampling / lgamma / digamma terms) — out of scope for the forward
    # kernel; value_net/const_net are not part of Network.forward.
    print("KERNEL_OK")
</pallas_src>

<mosaic_0001>
module attributes {stable_mosaic.version = 11 : i64} {
  func.func @_score_net_kernel(%arg0: i32, %arg1: memref<128x12xf32, #tpu.memory_space<vmem>>, %arg2: memref<12x128xbf16, #tpu.memory_space<vmem>>, %arg3: memref<1x128xf32, #tpu.memory_space<vmem>>, %arg4: memref<128x128xbf16, #tpu.memory_space<vmem>>, %arg5: memref<1x128xf32, #tpu.memory_space<vmem>>, %arg6: memref<4x128xbf16, #tpu.memory_space<vmem>>, %arg7: memref<4x1xf32, #tpu.memory_space<vmem>>, %arg8: memref<4x128xf32, #tpu.memory_space<vmem>>) attributes {dimension_semantics = [#tpu.dimension_semantics<parallel>], iteration_bounds = array<i64: 1>, scalar_prefetch = 0 : i64, scratch_operands = 0 : i64, tpu.core_type = #tpu.core_type<tc>, window_params = [{transform_indices = @transform_0, window_bounds = array<i64: 128, 12>}, {pipeline_mode = #tpu.pipeline_mode<synchronous>, transform_indices = @transform_1, window_bounds = array<i64: 12, 128>}, {pipeline_mode = #tpu.pipeline_mode<synchronous>, transform_indices = @transform_2, window_bounds = array<i64: 1, 128>}, {pipeline_mode = #tpu.pipeline_mode<synchronous>, transform_indices = @transform_3, window_bounds = array<i64: 128, 128>}, {pipeline_mode = #tpu.pipeline_mode<synchronous>, transform_indices = @transform_4, window_bounds = array<i64: 1, 128>}, {pipeline_mode = #tpu.pipeline_mode<synchronous>, transform_indices = @transform_5, window_bounds = array<i64: 4, 128>}, {pipeline_mode = #tpu.pipeline_mode<synchronous>, transform_indices = @transform_6, window_bounds = array<i64: 4, 1>}, {transform_indices = @transform_7, window_bounds = array<i64: 4, 128>}]} {
    %c0 = arith.constant 0 : index
    %c0_0 = arith.constant 0 : index
    %0 = vector.load %arg1[%c0, %c0_0] : memref<128x12xf32, #tpu.memory_space<vmem>>, vector<128x12xf32>
    %1 = arith.truncf %0 : vector<128x12xf32> to vector<128x12xbf16>
    %c0_1 = arith.constant 0 : index
    %c0_2 = arith.constant 0 : index
    %2 = vector.load %arg2[%c0_1, %c0_2] : memref<12x128xbf16, #tpu.memory_space<vmem>>, vector<12x128xbf16>
    %cst = arith.constant dense<0.000000e+00> : vector<128x128xf32>
    %3 = tpu.matmul %1, %2, %cst {dimension_numbers = #tpu.dot_dimension_numbers<[1], [0], [0], [1], [0, 0, 1, 1], [], []>} : vector<128x12xbf16>, vector<12x128xbf16>, vector<128x128xf32> -> vector<128x128xf32>
    %c0_3 = arith.constant 0 : index
    %c0_4 = arith.constant 0 : index
    %4 = vector.load %arg3[%c0_3, %c0_4] : memref<1x128xf32, #tpu.memory_space<vmem>>, vector<1x128xf32>
    %5 = vector.broadcast %4 : vector<1x128xf32> to vector<128x128xf32>
    %6 = arith.addf %3, %5 : vector<128x128xf32>
    %cst_5 = arith.constant 0.000000e+00 : f32
    %7 = vector.broadcast %cst_5 : f32 to vector<128x128xf32>
    %8 = arith.maximumf %6, %7 : vector<128x128xf32>
    %9 = arith.truncf %8 : vector<128x128xf32> to vector<128x128xbf16>
    %c0_6 = arith.constant 0 : index
    %c0_7 = arith.constant 0 : index
    %10 = vector.load %arg4[%c0_6, %c0_7] : memref<128x128xbf16, #tpu.memory_space<vmem>>, vector<128x128xbf16>
    %cst_8 = arith.constant dense<0.000000e+00> : vector<128x128xf32>
    %11 = tpu.matmul %9, %10, %cst_8 {dimension_numbers = #tpu.dot_dimension_numbers<[1], [0], [0], [1], [0, 0, 1, 1], [], []>} : vector<128x128xbf16>, vector<128x128xbf16>, vector<128x128xf32> -> vector<128x128xf32>
    %c0_9 = arith.constant 0 : index
    %c0_10 = arith.constant 0 : index
    %12 = vector.load %arg5[%c0_9, %c0_10] : memref<1x128xf32, #tpu.memory_space<vmem>>, vector<1x128xf32>
    %13 = vector.broadcast %12 : vector<1x128xf32> to vector<128x128xf32>
    %14 = arith.addf %11, %13 : vector<128x128xf32>
    %cst_11 = arith.constant 0.000000e+00 : f32
    %15 = vector.broadcast %cst_11 : f32 to vector<128x128xf32>
    %16 = arith.maximumf %14, %15 : vector<128x128xf32>
    %17 = arith.truncf %16 : vector<128x128xf32> to vector<128x128xbf16>
    %c0_12 = arith.constant 0 : index
    %c0_13 = arith.constant 0 : index
    %18 = vector.load %arg6[%c0_12, %c0_13] : memref<4x128xbf16, #tpu.memory_space<vmem>>, vector<4x128xbf16>
    %cst_14 = arith.constant dense<0.000000e+00> : vector<4x128xf32>
    %19 = tpu.matmul %18, %17, %cst_14 {dimension_numbers = #tpu.dot_dimension_numbers<[1], [1], [0], [0], [0, 0, 1, 0], [], []>} : vector<4x128xbf16>, vector<128x128xbf16>, vector<4x128xf32> -> vector<4x128xf32>
    %c0_15 = arith.constant 0 : index
    %c0_16 = arith.constant 0 : index
    %20 = vector.load %arg7[%c0_15, %c0_16] : memref<4x1xf32, #tpu.memory_space<vmem>>, vector<4x1xf32>
    %21 = vector.broadcast %20 : vector<4x1xf32> to vector<4x128xf32>
    %22 = arith.addf %19, %21 : vector<4x128xf32>
    %c0_17 = arith.constant 0 : index
    %c0_18 = arith.constant 0 : index
    %23 = vector.load %arg8[%c0_17, %c0_18] : memref<4x128xf32, #tpu.memory_space<vmem>>, vector<4x128xf32>
    tpu.vector_store %arg8[%c0_17, %c0_18], %22 {strides = array<i32>} : memref<4x128xf32, #tpu.memory_space<vmem>>, vector<4x128xf32>,
    return
  }
  func.func @transform_0(%arg0: i32) -> (i32, i32) {
    %c0_i32 = arith.constant 0 : i32
    %c0_i32_0 = arith.constant 0 : i32
    return %arg0, %c0_i32 : i32, i32
  }
  func.func @transform_1(%arg0: i32) -> (i32, i32) {
    %c0_i32 = arith.constant 0 : i32
    %c0_i32_0 = arith.constant 0 : i32
    %c0_i32_1 = arith.constant 0 : i32
    return %c0_i32, %c0_i32_0 : i32, i32
  }
  func.func @transform_2(%arg0: i32) -> (i32, i32) {
    %c0_i32 = arith.constant 0 : i32
    %c0_i32_0 = arith.constant 0 : i32
    %c0_i32_1 = arith.constant 0 : i32
    return %c0_i32, %c0_i32_0 : i32, i32
  }
  func.func @transform_3(%arg0: i32) -> (i32, i32) {
    %c0_i32 = arith.constant 0 : i32
    %c0_i32_0 = arith.constant 0 : i32
    %c0_i32_1 = arith.constant 0 : i32
    return %c0_i32, %c0_i32_0 : i32, i32
  }
  func.func @transform_4(%arg0: i32) -> (i32, i32) {
    %c0_i32 = arith.constant 0 : i32
    %c0_i32_0 = arith.constant 0 : i32
    %c0_i32_1 = arith.constant 0 : i32
    return %c0_i32, %c0_i32_0 : i32, i32
  }
  func.func @transform_5(%arg0: i32) -> (i32, i32) {
    %c0_i32 = arith.constant 0 : i32
    %c0_i32_0 = arith.constant 0 : i32
    %c0_i32_1 = arith.constant 0 : i32
    return %c0_i32, %c0_i32_0 : i32, i32
  }
  func.func @transform_6(%arg0: i32) -> (i32, i32) {
    %c0_i32 = arith.constant 0 : i32
    %c0_i32_0 = arith.constant 0 : i32
    %c0_i32_1 = arith.constant 0 : i32
    return %c0_i32, %c0_i32_0 : i32, i32
  }
  func.func @transform_7(%arg0: i32) -> (i32, i32) {
    %c0_i32 = arith.constant 0 : i32
    %c0_i32_0 = arith.constant 0 : i32
    return %c0_i32, %arg0 : i32, i32
  }
}

</mosaic_0001>

<bundles_post_ra>
// kernel: score_net_forward.1
= control target key start
LH: loop header
LB: loop body
LE: loop exit
PB: predicated region body
PF: predicated region fallthrough
CT: control target
= control target key end

     0   :  { %vm90_vm0 = vcmask 1045504   ;;  %vm65_vm1 = vcmask 97280   ;;  %vm597_vm2 = vmmov 0   ;;  %s746_s1 = inlined_call_operand.vmem [shape: bf16[12,128], index: 1, kind: input, shape index: {}]   ;;  %s747_s0 = inlined_call_operand.vmem [shape: f32[128,12], index: 0, kind: input, shape index: {}]   ;;  %s748_s3 = inlined_call_operand.vmem [shape: bf16[128,128], index: 3, kind: input, shape index: {}]   ;;  %s749_s2 = inlined_call_operand.vmem [shape: f32[1,128], index: 2, kind: input, shape index: {}]   ;;  %s750_s6 = inlined_call_operand.vmem [shape: f32[4,1], index: 6, kind: input, shape index: {}]   ;;  %s751_s4 = inlined_call_operand.vmem [shape: f32[1,128], index: 4, kind: input, shape index: {}]   ;;  %s752_s5 = inlined_call_operand.vmem [shape: bf16[4,128], index: 5, kind: input, shape index: {}]   ;;  %s753_s7 = inlined_call_operand.vmem [shape: f32[4,128], index: 7, kind: output, shape index: {}]  }
   0x1   :  { %v587_v0 = vld [vmem:[%s746_s1] sm:$0x3f]   ;;  %v28_v2 = vld [vmem:[%s747_s0 + $0x8] sm:$0xff]  ;;  %v29_v3 = vld [vmem:[%s747_s0 + $0x10] sm:$0xff] }
   0x2   :  { %v27_v1 = vld [vmem:[%s747_s0] sm:$0xff]  ;;  %582 = vmatprep.subr.msk.bf16.mxu1 %vm90_vm0, %v587_v0  ;;  %v92_v4 = vsel %vm90_vm0, %v587_v0, 0  ;;  %v30_v6 = vld [vmem:[%s747_s0 + $0x18] sm:$0xff]  ;;  %v32_v8 = vld [vmem:[%s747_s0 + $0x28] sm:$0xff] }
   0x3   :  { %v43_v5 = vpack.c.bf16 %v28_v2, %v27_v1  ;;  %v31_v7 = vld [vmem:[%s747_s0 + $0x20] sm:$0xff]  ;;  %513 = vmatpush3.bf16.msra.mxu1 %v92_v4  ;;  %v44_v9 = vpack.c.bf16 %v30_v6, %v29_v3  ;;  %v33_v11 = vld [vmem:[%s747_s0 + $0x30] sm:$0xff]  ;;  %v34_v12 = vld [vmem:[%s747_s0 + $0x38] sm:$0xff] }
   0x4   :  { %v45_v10 = vpack.c.bf16 %v32_v8, %v31_v7  ;;  %v35_v13 = vld [vmem:[%s747_s0 + $0x40] sm:$0xff]  ;;  %v36_v14 = vld [vmem:[%s747_s0 + $0x48] sm:$0xff]  ;;  %v46_v17 = vpack.c.bf16 %v34_v12, %v33_v11  ;;  %v590_v19 = vld [vmem:[%s748_s3 + $0x10] sm:$0xff]  }
   0x5   :  { %514 = vmatprep.mubr.msk.bf16.mxu1 %vm65_vm1, %v43_v5  ;;  %v588_v15 = vld [vmem:[%s748_s3] sm:$0xff]   ;;  %v589_v16 = vld [vmem:[%s748_s3 + $0x8] sm:$0xff]   ;;  %v47_v18 = vpack.c.bf16 %v36_v14, %v35_v13  ;;  %v37_v20 = vld [vmem:[%s747_s0 + $0x50] sm:$0xff] }
   0x6   :  { %515 = vmatmul.mubr.msk.bf16.vlgmr.msra.gmra.mrb[0].mxu1 %vm65_vm1, %v44_v9  ;;  %530 = vmatprep.subr.bf16.mxu1 %v588_v15  ;;  %v38_v21 = vld [vmem:[%s747_s0 + $0x58] sm:$0xff]  ;;  %v39_v22 = vld [vmem:[%s747_s0 + $0x60] sm:$0xff]  ;;  %v40_v23 = vld [vmem:[%s747_s0 + $0x68] sm:$0xff] }
   0x7   :  { %518 = vmatprep.mubr.msk.bf16.mxu1 %vm65_vm1, %v45_v10  ;;  %531 = vmatpush3.bf16.msra.mxu1 %v588_v15  ;;  %v591_v24 = vld [vmem:[%s748_s3 + $0x18] sm:$0xff]   ;;  %v48_v25 = vpack.c.bf16 %v38_v21, %v37_v20  ;;  %v49_v26 = vpack.c.bf16 %v40_v23, %v39_v22  ;;  %v592_v27 = vld [vmem:[%s748_s3 + $0x20] sm:$0xff]   ;;  %v41_v28 = vld [vmem:[%s747_s0 + $0x70] sm:$0xff] }
   0x8   :  { %532 = vmatprep.subr.bf16.mxu1 %v589_v16  ;;  %v42_v29 = vld [vmem:[%s747_s0 + $0x78] sm:$0xff]  ;;  %v593_v30 = vld [vmem:[%s748_s3 + $0x28] sm:$0xff]   ;;  %v594_v32 = vld [vmem:[%s748_s3 + $0x30] sm:$0xff]  }
   0x9   :  { %v50_v31 = vpack.c.bf16 %v42_v29, %v41_v28  ;;  %v595_v33 = vld [vmem:[%s748_s3 + $0x38] sm:$0xff]   ;;  %v459_v34 = vld [vmem:[%s749_s2] ss:$0 sm:$0xff]  ;;  %v598_v28 = vmov 0  }
   0xa   :  { %586 = vset.pattern.permute.xlu0 %v598_v28  ;;  %v408_v29 = vld [vmem:[%s750_s6] sm:$0xf] }
   0xb   :  { %533 = vmatpush3.bf16.msra.mxu1 %v589_v16  ;;  %411 = vperm.xlu0 %586, %v408_v29  }
   0xc   :  { %534 = vmatprep.subr.bf16.mxu1 %v590_v19 }
   0xe   :  { %519 = vmatmul.mubr.msk.bf16.gmra.mrb[4].mxu1 %vm65_vm1, %v46_v17 }
   0xf   :  { %522 = vmatprep.mubr.msk.bf16.mxu1 %vm65_vm1, %v47_v18  ;;  %535 = vmatpush3.bf16.msra.mxu1 %v590_v19 }
  0x10   :  { %536 = vmatprep.subr.bf16.mxu1 %v591_v24 }
  0x13   :  { %537 = vmatpush3.bf16.msra.mxu1 %v591_v24 }
  0x14   :  { %538 = vmatprep.subr.bf16.mxu1 %v592_v27 }
  0x16   :  { %523 = vmatmul.mubr.msk.bf16.gmra.mrb[8].mxu1 %vm65_vm1, %v48_v25 }
  0x17   :  { %526 = vmatprep.mubr.msk.bf16.mxu1 %vm65_vm1, %v49_v26  ;;  %539 = vmatpush3.bf16.msra.mxu1 %v592_v27  ;;  %v596_v27 = vmov 0.0  }
  0x18   :  { %540 = vmatprep.subr.bf16.mxu1 %v593_v30  ;;  %562 = vmatprep.subr.bf16.mxu0 %v596_v27 }
  0x19   :  { %578 = vmatprep.mubr.msk.bf16.mxu0 %vm597_vm2, %v596_v27 }
  0x1b   :  { %541 = vmatpush3.bf16.msra.mxu1 %v593_v30  ;;  %v469_v30 = vld [vmem:[%s751_s4] ss:$0 sm:$0xff] }
  0x1c   :  { %542 = vmatprep.subr.bf16.mxu1 %v594_v32 }
  0x1e   :  { %527 = vmatmul.mubr.msk.bf16.gmra.mrb[12].mxu1 %vm65_vm1, %v50_v31 }
  0x1f   :  { %543 = vmatpush3.bf16.msra.mxu1 %v594_v32 }
  0x20   :  { %544 = vmatprep.subr.bf16.mxu1 %v595_v33 }
  0x23   :  { %545 = vmatpush3.bf16.msra.mxu1 %v595_v33 }
  0xd9   :  { %v516_v35 = vpop.f32.mrb[0].mxu1 }
  0xda   :  { %v137_v36 = vadd.f32 %v516_v35, %v459_v34  ;;  %v128_v37 = vpop.f32.mrb[1].mxu1 }
  0xdb   :  { %v129_v38 = vadd.f32 %v459_v34, %v128_v37  ;;  %v517_v39 = vpop.f32.mrb[2].mxu1 }
  0xdc   :  { %v140_v40 = vadd.f32 %v517_v39, %v459_v34  ;;  %v131_v41 = vpop.f32.mrb[3].mxu1  ;;  %v193_v43 = vmax.f32 %v137_v36, 0.0 }
  0xdd   :  { %v132_v42 = vadd.f32 %v459_v34, %v131_v41  ;;  %v191_v45 = vmax.f32 %v129_v38, 0.0 }
  0xde   :  { %v194_v44 = vmax.f32 %v140_v40, 0.0 }
  0xdf   :  { %v192_v46 = vmax.f32 %v132_v42, 0.0 }
  0xe0   :  { %v208_v47 = vpack.c.bf16 %v194_v44, %v193_v43 }
  0xe1   :  { %v207_v48 = vpack.c.bf16 %v192_v46, %v191_v45  ;;  %v520_v49 = vpop.f32.mrb[4].mxu1 }
  0xe2   :  { %v153_v50 = vadd.f32 %v520_v49, %v459_v34  ;;  %v144_v51 = vpop.f32.mrb[5].mxu1 }
  0xe3   :  { %v145_v52 = vadd.f32 %v459_v34, %v144_v51  ;;  %546 = vmatprep.mubr.bf16.mxu1 %v207_v48  ;;  %v521_v53 = vpop.f32.mrb[6].mxu1 }
  0xe4   :  { %v197_v54 = vmax.f32 %v153_v50, 0.0  ;;  %v156_v55 = vadd.f32 %v521_v53, %v459_v34  ;;  %547 = vmatmul.mubr.bf16.vlgmr.msra.gmra.mrb[16].mxu1 %v208_v47  ;;  %v147_v56 = vpop.f32.mrb[7].mxu1 }
  0xe5   :  { %v195_v57 = vmax.f32 %v145_v52, 0.0  ;;  %v148_v58 = vadd.f32 %v459_v34, %v147_v56 }
  0xe6   :  { %v198_v59 = vmax.f32 %v156_v55, 0.0 }
  0xe7   :  { %v196_v60 = vmax.f32 %v148_v58, 0.0 }
  0xe8   :  { %v210_v61 = vpack.c.bf16 %v198_v59, %v197_v54 }
  0xe9   :  { %v209_v62 = vpack.c.bf16 %v196_v60, %v195_v57  ;;  %v524_v63 = vpop.f32.mrb[8].mxu1 }
  0xea   :  { %v169_v0 = vadd.f32 %v524_v63, %v459_v34  ;;  %v160_v1 = vpop.f32.mrb[9].mxu1 }
  0xeb   :  { %550 = vmatprep.mubr.bf16.mxu1 %v209_v62  ;;  %v161_v2 = vadd.f32 %v459_v34, %v160_v1  ;;  %v525_v3 = vpop.f32.mrb[10].mxu1 }
  0xec   :  { %551 = vmatmul.mubr.bf16.gmra.mrb[20].mxu1 %v210_v61  ;;  %v201_v4 = vmax.f32 %v169_v0, 0.0  ;;  %v172_v5 = vadd.f32 %v525_v3, %v459_v34  ;;  %v163_v6 = vpop.f32.mrb[11].mxu1 }
  0xed   :  { %v199_v7 = vmax.f32 %v161_v2, 0.0  ;;  %v164_v8 = vadd.f32 %v459_v34, %v163_v6 }
  0xee   :  { %v202_v9 = vmax.f32 %v172_v5, 0.0 }
  0xef   :  { %v200_v10 = vmax.f32 %v164_v8, 0.0 }
  0xf0   :  { %v212_v11 = vpack.c.bf16 %v202_v9, %v201_v4 }
  0xf1   :  { %v211_v12 = vpack.c.bf16 %v200_v10, %v199_v7  ;;  %v528_v13 = vpop.f32.mrb[12].mxu1 }
  0xf2   :  { %v185_v14 = vadd.f32 %v528_v13, %v459_v34  ;;  %v176_v15 = vpop.f32.mrb[13].mxu1 }
  0xf3   :  { %554 = vmatprep.mubr.bf16.mxu1 %v211_v12  ;;  %v177_v16 = vadd.f32 %v459_v34, %v176_v15  ;;  %v529_v17 = vpop.f32.mrb[14].mxu1 }
  0xf4   :  { %555 = vmatmul.mubr.bf16.gmra.mrb[24].mxu1 %v212_v11  ;;  %v205_v18 = vmax.f32 %v185_v14, 0.0  ;;  %v188_v19 = vadd.f32 %v529_v17, %v459_v34  ;;  %v179_v20 = vpop.f32.mrb[15].mxu1 }
  0xf5   :  { %v203_v21 = vmax.f32 %v177_v16, 0.0  ;;  %v180_v22 = vadd.f32 %v459_v34, %v179_v20 }
  0xf6   :  { %v206_v23 = vmax.f32 %v188_v19, 0.0 }
  0xf7   :  { %v204_v24 = vmax.f32 %v180_v22, 0.0 }
  0xf8   :  { %v214_v25 = vpack.c.bf16 %v206_v23, %v205_v18  ;;  %v407_v23 = vld [vmem:[%s752_s5] sm:$0x3] }
  0xf9   :  { %v213_v26 = vpack.c.bf16 %v204_v24, %v203_v21  ;;  %v412_v24 = vpop.permute.xlu0 %411 }
  0xfb   :  { %558 = vmatprep.mubr.bf16.mxu1 %v213_v26 }
  0xfc   :  { %559 = vmatmul.mubr.bf16.gmra.mrb[28].mxu1 %v214_v25 }
 0x1b7   :  { %v548_v31 = vpop.f32.mrb[16].mxu1 }
 0x1b8   :  { %v329_v32 = vadd.f32 %v548_v31, %v469_v30  ;;  %v320_v33 = vpop.f32.mrb[17].mxu1 }
 0x1b9   :  { %v321_v34 = vadd.f32 %v469_v30, %v320_v33  ;;  %v549_v35 = vpop.f32.mrb[18].mxu1 }
 0x1ba   :  { %v332_v36 = vadd.f32 %v549_v35, %v469_v30  ;;  %v323_v37 = vpop.f32.mrb[19].mxu1  ;;  %v385_v39 = vmax.f32 %v329_v32, 0.0 }
 0x1bb   :  { %v324_v38 = vadd.f32 %v469_v30, %v323_v37  ;;  %v383_v41 = vmax.f32 %v321_v34, 0.0 }
 0x1bc   :  { %v386_v40 = vmax.f32 %v332_v36, 0.0 }
 0x1bd   :  { %v384_v42 = vmax.f32 %v324_v38, 0.0 }
 0x1be   :  { %v400_v43 = vpack.c.bf16 %v386_v40, %v385_v39 }
 0x1bf   :  { %v552_v44 = vpop.f32.mrb[20].mxu1  ;;  %v399_v45 = vpack.c.bf16 %v384_v42, %v383_v41 }
 0x1c0   :  { %v345_v46 = vadd.f32 %v552_v44, %v469_v30  ;;  %v336_v47 = vpop.f32.mrb[21].mxu1 }
 0x1c1   :  { %v337_v48 = vadd.f32 %v469_v30, %v336_v47  ;;  %563 = vmatpush3.bf16.xpose.msra.mxu0 %v399_v45  ;;  %v553_v49 = vpop.f32.mrb[22].mxu1 }
 0x1c2   :  { %v389_v50 = vmax.f32 %v345_v46, 0.0  ;;  %v348_v51 = vadd.f32 %v553_v49, %v469_v30  ;;  %v339_v52 = vpop.f32.mrb[23].mxu1  ;;  %564 = vmatprep.subr.bf16.mxu0 %v596_v27 }
 0x1c3   :  { %v387_v53 = vmax.f32 %v337_v48, 0.0  ;;  %v340_v54 = vadd.f32 %v469_v30, %v339_v52 }
 0x1c4   :  { %v390_v55 = vmax.f32 %v348_v51, 0.0 }
 0x1c5   :  { %v388_v56 = vmax.f32 %v340_v54, 0.0 }
 0x1c6   :  { %v402_v57 = vpack.c.bf16 %v390_v55, %v389_v50 }
 0x1c7   :  { %v401_v58 = vpack.c.bf16 %v388_v56, %v387_v53  ;;  %v556_v59 = vpop.f32.mrb[24].mxu1 }
 0x1c8   :  { %v361_v60 = vadd.f32 %v556_v59, %v469_v30  ;;  %v352_v61 = vpop.f32.mrb[25].mxu1 }
 0x1c9   :  { %565 = vmatpush3.bf16.xpose.msra.mxu0 %v400_v43  ;;  %v353_v62 = vadd.f32 %v469_v30, %v352_v61  ;;  %v557_v63 = vpop.f32.mrb[26].mxu1 }
 0x1ca   :  { %v393_v0 = vmax.f32 %v361_v60, 0.0  ;;  %566 = vmatprep.subr.bf16.mxu0 %v596_v27  ;;  %v364_v1 = vadd.f32 %v557_v63, %v469_v30  ;;  %v355_v2 = vpop.f32.mrb[27].mxu1 }
 0x1cb   :  { %v391_v3 = vmax.f32 %v353_v62, 0.0  ;;  %v356_v4 = vadd.f32 %v469_v30, %v355_v2 }
 0x1cc   :  { %v394_v5 = vmax.f32 %v364_v1, 0.0 }
 0x1cd   :  { %v392_v6 = vmax.f32 %v356_v4, 0.0 }
 0x1ce   :  { %v404_v7 = vpack.c.bf16 %v394_v5, %v393_v0 }
 0x1cf   :  { %v403_v8 = vpack.c.bf16 %v392_v6, %v391_v3  ;;  %v560_v9 = vpop.f32.mrb[28].mxu1 }
 0x1d0   :  { %v377_v10 = vadd.f32 %v560_v9, %v469_v30  ;;  %v368_v11 = vpop.f32.mrb[29].mxu1 }
 0x1d1   :  { %567 = vmatpush3.bf16.xpose.msra.mxu0 %v401_v58  ;;  %v369_v12 = vadd.f32 %v469_v30, %v368_v11  ;;  %v561_v13 = vpop.f32.mrb[30].mxu1 }
 0x1d2   :  { %568 = vmatprep.subr.bf16.mxu0 %v596_v27  ;;  %v397_v14 = vmax.f32 %v377_v10, 0.0  ;;  %v380_v15 = vadd.f32 %v561_v13, %v469_v30  ;;  %v371_v16 = vpop.f32.mrb[31].mxu1 }
 0x1d3   :  { %v395_v17 = vmax.f32 %v369_v12, 0.0  ;;  %v372_v18 = vadd.f32 %v469_v30, %v371_v16 }
 0x1d4   :  { %v398_v19 = vmax.f32 %v380_v15, 0.0 }
 0x1d5   :  { %v396_v20 = vmax.f32 %v372_v18, 0.0 }
 0x1d6   :  { %v406_v21 = vpack.c.bf16 %v398_v19, %v397_v14 }
 0x1d7   :  { %v405_v22 = vpack.c.bf16 %v396_v20, %v395_v17 }
 0x1d9   :  { %569 = vmatpush3.bf16.xpose.msra.mxu0 %v402_v57 }
 0x1da   :  { %570 = vmatprep.subr.bf16.mxu0 %v596_v27 }
 0x1e1   :  { %571 = vmatpush3.bf16.xpose.msra.mxu0 %v403_v8 }
 0x1e2   :  { %572 = vmatprep.subr.bf16.mxu0 %v596_v27 }
 0x1e9   :  { %573 = vmatpush3.bf16.xpose.msra.mxu0 %v404_v7 }
 0x1ea   :  { %574 = vmatprep.subr.bf16.mxu0 %v596_v27 }
 0x1f1   :  { %575 = vmatpush3.bf16.xpose.msra.mxu0 %v405_v22 }
 0x1f2   :  { %576 = vmatprep.subr.bf16.mxu0 %v596_v27 }
 0x1f9   :  { %577 = vmatpush3.bf16.xpose.msra.mxu0 %v406_v21 }
 0x200   :  { %579 = vmatmul.mubr.bf16.vlgmr.msra.gmra.mrb[0].mxu0 %v407_v23 }
 0x2d3   :  { %v448_v25 = vpop.f32.mrb[0].mxu0 }
 0x2d4   :  { %v449_v26 = vadd.f32 %v448_v25, %v412_v24  ;;  %v580_v28 = vpop.f32.mrb[1].mxu0 }
 0x2d5   :  { %v451_v29 = vpop.f32.mrb[2].mxu0 }
 0x2d6   :  { %454 = vst [vmem:[%s753_s7] sm:$0xf] %v449_v26  ;;  %v581_v30 = vpop.f32.mrb[3].mxu0 }

</bundles_post_ra>
